<compile_context>
chip_gen: v7x
topology: tpu7x:2x2x1
jax: 0.10.0
libtpu: 0.0.40
codegen_flags: <defaults>
</compile_context>

<pallas_src>
import jax
import jax.numpy as jnp
from jax.experimental import pallas as pl
from jax.experimental.pallas import tpu as pltpu


# --------------------------------------------------------------------------- #
# Kernels
# --------------------------------------------------------------------------- #
def _rope_dup_kernel(inv_dup_ref, pos_ref, cos_ref, sin_ref):
    # inv_dup_ref: (1, emb_dim) f32  -- [inv_freq | inv_freq], pre-duplicated.
    # pos_ref:     (TN, 1)     f32  -- sublane-major rows (no in-kernel transpose).
    # cos_ref/sin_ref: (TN, emb_dim) out dtype.
    freqs = pos_ref[...] * inv_dup_ref[...]            # (TN,1)*(1,E) -> (TN,E) f32
    cos_ref[...] = jnp.cos(freqs).astype(cos_ref.dtype)
    sin_ref[...] = jnp.sin(freqs).astype(sin_ref.dtype)


def _rope_half_kernel(inv_ref, pos_ref, cos_ref, sin_ref):
    # inv_ref: (1, half) f32 with half >= 128 (halves are lane-aligned).
    # Compute cos/sin on the half width only (2x fewer transcendentals) and
    # store each result twice into aligned halves -- no concatenate temporary.
    freqs = pos_ref[...] * inv_ref[...]                 # (TN, half) f32
    half = freqs.shape[-1]
    c = jnp.cos(freqs)
    s = jnp.sin(freqs)
    cos_ref[:, :half] = c.astype(cos_ref.dtype)
    cos_ref[:, half:] = c.astype(cos_ref.dtype)
    sin_ref[:, :half] = s.astype(sin_ref.dtype)
    sin_ref[:, half:] = s.astype(sin_ref.dtype)


# --------------------------------------------------------------------------- #
# Tiling helper
# --------------------------------------------------------------------------- #
def _round_up(x, m):
    return ((x + m - 1) // m) * m


def _pick_row_tile(n_rows, emb_dim, out_itemsize, max_rows=4096,
                   vmem_budget_bytes=24 << 20):
    """Rows per grid step for the flattened (B*S, emb_dim) output view.

    Budget per row: 2 outputs x 2 (double-buffer) x out_itemsize lanes plus
    ~4 f32 in-kernel temporaries (freqs/cos/sin/casts). Stays well under the
    32 MiB scoped VMEM default (v7x: 64 MiB physical / 32 MiB scoped).
    """
    per_row = emb_dim * (4 * out_itemsize + 16) + 16
    budget_rows = max(8, vmem_budget_bytes // per_row)
    tn = min(max_rows, budget_rows)
    tn = max(8, (tn // 8) * 8)
    if n_rows <= tn:
        if n_rows >= 16:
            # Keep >= 2 grid steps: lets both v7x TensorCores (and the
            # software pipeline) do useful work instead of one giant step.
            tn = _round_up(-(-n_rows // 2), 8)
        else:
            tn = n_rows          # tiny input: one full-extent block is legal
    return tn


# --------------------------------------------------------------------------- #
# Module
# --------------------------------------------------------------------------- #
class LlamaRotaryEmbedding:
    """JAX/Pallas port of openrlhf LlamaRotaryEmbedding."""

    def __init__(self, dim, max_position_embeddings=2048, base=10000,
                 scaling_factor=1.0):
        if dim % 2 != 0:
            raise ValueError("LlamaRotaryEmbedding requires an even `dim` "
                             "(cat([freqs, freqs]) width must equal dim).")
        self.dim = dim
        self.max_position_embeddings = max_position_embeddings
        self.base = base
        self.scaling_factor = scaling_factor
        # inv_freq = 1 / base ** (arange(0, dim, 2) / dim)
        self.inv_freq = 1.0 / (
            base ** (jnp.arange(0, dim, 2, dtype=jnp.float32) / dim)
        )  # (dim // 2,)
        # Cached cos/sin are never read by forward(); build lazily on demand.
        self._cos_cached = None
        self._sin_cached = None
        # TODO(synk): the deepspeed torch.arange hook / .to('cuda') buffer moves
        # in the reference __init__ are framework bookkeeping with no Pallas
        # equivalent.

    def _build_cache(self):
        # Matches the PyTorch __init__ buffers: the cache applies
        # scaling_factor to t even though forward() never does.
        t = (jnp.arange(self.max_position_embeddings, dtype=jnp.float32)
             / self.scaling_factor)
        freqs = jnp.outer(t, self.inv_freq)
        emb = jnp.concatenate([freqs, freqs], axis=-1)
        self._cos_cached = jnp.cos(emb)
        self._sin_cached = jnp.sin(emb)

    @property
    def cos_cached(self):
        if self._cos_cached is None:
            self._build_cache()
        return self._cos_cached

    @property
    def sin_cached(self):
        if self._sin_cached is None:
            self._build_cache()
        return self._sin_cached

    def __call__(self, x, position_ids, seq_len=None, *,
                 max_rows_per_tile=4096, shared_positions=False):
        """x: dtype carrier only. position_ids: (B, S) int.

        shared_positions=True: computes cos/sin once for batch row 0 and
        returns (1, S, dim) -- the consumer broadcasts over batch implicitly
        (avoids re-materializing B copies in HBM).
        NOTE: like the PyTorch forward, scaling_factor is NOT applied here.
        """
        out_dtype = x.dtype
        pos_in = position_ids[:1] if shared_positions else position_ids
        Bk, S = pos_in.shape

        half = self.dim // 2
        emb_dim = 2 * half                      # == dim (dim asserted even)

        N = Bk * S                              # flattened row count
        pos_col = pos_in.reshape(N, 1).astype(jnp.float32)   # sublane-major

        itemsize = jnp.dtype(out_dtype).itemsize
        TN = _pick_row_tile(N, emb_dim, itemsize, max_rows=max_rows_per_tile)
        grid = (pl.cdiv(N, TN),)                # ragged tail handled by Pallas

        if half < 128:
            # Half-width compute saves nothing below one vreg of lanes; feed
            # the kernel pre-duplicated [inv | inv] and store full rows.
            inv_in = jnp.concatenate([self.inv_freq, self.inv_freq]
                                     ).reshape(1, emb_dim)
            kernel = _rope_dup_kernel
            W = emb_dim
        else:
            inv_in = self.inv_freq.reshape(1, half)
            kernel = _rope_half_kernel
            W = half

        cost = pl.CostEstimate(
            flops=N * emb_dim,
            transcendentals=N * emb_dim,
            bytes_accessed=2 * N * emb_dim * itemsize + N * 4 + W * 4,
        )

        cos2d, sin2d = pl.pallas_call(
            kernel,
            out_shape=(jax.ShapeDtypeStruct((N, emb_dim), out_dtype),
                       jax.ShapeDtypeStruct((N, emb_dim), out_dtype)),
            grid_spec=pltpu.PrefetchScalarGridSpec(
                num_scalar_prefetch=0,
                grid=grid,
                in_specs=[
                    pl.BlockSpec((1, W), lambda i: (0, 0)),    # inv_freq (tiny)
                    pl.BlockSpec((TN, 1), lambda i: (i, 0)),   # positions
                ],
                out_specs=[
                    pl.BlockSpec((TN, emb_dim), lambda i: (i, 0)),
                    pl.BlockSpec((TN, emb_dim), lambda i: (i, 0)),
                ]),
            compiler_params=pltpu.CompilerParams(
                dimension_semantics=("parallel",)),
            cost_estimate=cost,
        )(inv_in, pos_col)

        # Row-major (N, E) -> (Bk, S, E) is a layout-preserving (free) reshape.
        cos = cos2d.reshape(Bk, S, emb_dim)
        sin = sin2d.reshape(Bk, S, emb_dim)
        return cos, sin


# --------------------------------------------------------------------------- #
# Tests
# --------------------------------------------------------------------------- #
if __name__ == "__main__":
    def reference(inv_freq, position_ids, out_dtype):
        freqs = (position_ids.astype(jnp.float32)[:, :, None]
                 * inv_freq[None, None, :])
        emb = jnp.concatenate([freqs, freqs], axis=-1)
        return jnp.cos(emb).astype(out_dtype), jnp.sin(emb).astype(out_dtype)

    key = jax.random.PRNGKey(0)

    # --- test 1: small dim (pre-duplicated inv_freq path) ---------------------
    B, S, dim, hidden = 2, 8, 32, 32
    x = jax.random.normal(key, (B, S, hidden), dtype=jnp.float32)
    position_ids = jnp.broadcast_to(jnp.arange(S, dtype=jnp.int32)[None, :], (B, S))
    rope = LlamaRotaryEmbedding(dim=dim, max_position_embeddings=2048, base=10000)
    cos, sin = jax.block_until_ready(rope(x, position_ids))
    cos_ref, sin_ref = reference(rope.inv_freq, position_ids, x.dtype)
    assert cos.shape == (B, S, dim) and sin.shape == (B, S, dim)
    assert jnp.allclose(cos, cos_ref, atol=1e-5, rtol=1e-5)
    assert jnp.allclose(sin, sin_ref, atol=1e-5, rtol=1e-5)

    # --- test 2: Llama head_dim=128, ragged row tiling (N=200, tile=128) ------
    B2, S2, dim2 = 1, 200, 128
    x2 = jax.random.normal(jax.random.PRNGKey(0), (B2, S2, dim2), dtype=jnp.float32)
    pos2 = jnp.broadcast_to(jnp.arange(S2, dtype=jnp.int32)[None, :], (B2, S2))
    rope2 = LlamaRotaryEmbedding(dim=dim2)
    cos2, sin2 = jax.block_until_ready(rope2(x2, pos2, max_rows_per_tile=128))
    cos2_ref, sin2_ref = reference(rope2.inv_freq, pos2, x2.dtype)
    assert cos2.shape == (B2, S2, dim2)
    assert jnp.allclose(cos2, cos2_ref, atol=1e-5, rtol=1e-5)
    assert jnp.allclose(sin2, sin2_ref, atol=1e-5, rtol=1e-5)

    # --- test 3: dim >= 256 -> genuine half-width compute + aligned stores ----
    B3, S3, dim3 = 1, 64, 256
    x3 = jax.random.normal(jax.random.PRNGKey(0), (B3, S3, dim3), dtype=jnp.float32)
    pos3 = jnp.broadcast_to(jnp.arange(S3, dtype=jnp.int32)[None, :], (B3, S3))
    rope3 = LlamaRotaryEmbedding(dim=dim3)
    cos3, sin3 = jax.block_until_ready(rope3(x3, pos3))
    cos3_ref, sin3_ref = reference(rope3.inv_freq, pos3, x3.dtype)
    assert cos3.shape == (B3, S3, dim3)
    assert jnp.allclose(cos3, cos3_ref, atol=1e-5, rtol=1e-5)
    assert jnp.allclose(sin3, sin3_ref, atol=1e-5, rtol=1e-5)

    # --- test 4: shared-positions fast path (dedup; (1, S, dim) returned) -----
    cos4, sin4 = jax.block_until_ready(rope(x, position_ids, shared_positions=True))
    assert cos4.shape == (1, S, dim)
    assert jnp.allclose(cos4[0], cos_ref[0], atol=1e-5, rtol=1e-5)
    assert jnp.allclose(sin4[0], sin_ref[0], atol=1e-5, rtol=1e-5)

    print("KERNEL_OK")
</pallas_src>

<mosaic_0001>
module attributes {stable_mosaic.version = 11 : i64} {
  func.func @_rope_dup_kernel(%arg0: i32, %arg1: memref<1x32xf32, #tpu.memory_space<vmem>>, %arg2: memref<8x1xf32, #tpu.memory_space<vmem>>, %arg3: memref<8x32xf32, #tpu.memory_space<vmem>>, %arg4: memref<8x32xf32, #tpu.memory_space<vmem>>) attributes {dimension_semantics = [#tpu.dimension_semantics<parallel>], iteration_bounds = array<i64: 2>, scalar_prefetch = 0 : i64, scratch_operands = 0 : i64, tpu.core_type = #tpu.core_type<tc>, window_params = [{pipeline_mode = #tpu.pipeline_mode<synchronous>, transform_indices = @transform_0, window_bounds = array<i64: 1, 32>}, {transform_indices = @transform_1, window_bounds = array<i64: 8, 1>}, {transform_indices = @transform_2, window_bounds = array<i64: 8, 32>}, {transform_indices = @transform_3, window_bounds = array<i64: 8, 32>}]} {
    %c0 = arith.constant 0 : index
    %c0_0 = arith.constant 0 : index
    %0 = vector.load %arg2[%c0, %c0_0] : memref<8x1xf32, #tpu.memory_space<vmem>>, vector<8x1xf32>
    %c0_1 = arith.constant 0 : index
    %c0_2 = arith.constant 0 : index
    %1 = vector.load %arg1[%c0_1, %c0_2] : memref<1x32xf32, #tpu.memory_space<vmem>>, vector<1x32xf32>
    %2 = vector.broadcast %0 : vector<8x1xf32> to vector<8x32xf32>
    %3 = vector.broadcast %1 : vector<1x32xf32> to vector<8x32xf32>
    %4 = arith.mulf %2, %3 : vector<8x32xf32>
    %5 = math.cos %4 : vector<8x32xf32>
    %c0_3 = arith.constant 0 : index
    %c0_4 = arith.constant 0 : index
    %6 = vector.load %arg3[%c0_3, %c0_4] : memref<8x32xf32, #tpu.memory_space<vmem>>, vector<8x32xf32>
    tpu.vector_store %arg3[%c0_3, %c0_4], %5 {strides = array<i32>} : memref<8x32xf32, #tpu.memory_space<vmem>>, vector<8x32xf32>,
    %7 = math.sin %4 : vector<8x32xf32>
    %c0_5 = arith.constant 0 : index
    %c0_6 = arith.constant 0 : index
    %8 = vector.load %arg4[%c0_5, %c0_6] : memref<8x32xf32, #tpu.memory_space<vmem>>, vector<8x32xf32>
    tpu.vector_store %arg4[%c0_5, %c0_6], %7 {strides = array<i32>} : memref<8x32xf32, #tpu.memory_space<vmem>>, vector<8x32xf32>,
    return
  }
  func.func @transform_0(%arg0: i32) -> (i32, i32) {
    %c0_i32 = arith.constant 0 : i32
    %c0_i32_0 = arith.constant 0 : i32
    %c0_i32_1 = arith.constant 0 : i32
    return %c0_i32, %c0_i32_0 : i32, i32
  }
  func.func @transform_1(%arg0: i32) -> (i32, i32) {
    %c0_i32 = arith.constant 0 : i32
    %c0_i32_0 = arith.constant 0 : i32
    return %arg0, %c0_i32 : i32, i32
  }
  func.func @transform_2(%arg0: i32) -> (i32, i32) {
    %c0_i32 = arith.constant 0 : i32
    %c0_i32_0 = arith.constant 0 : i32
    return %arg0, %c0_i32 : i32, i32
  }
  func.func @transform_3(%arg0: i32) -> (i32, i32) {
    %c0_i32 = arith.constant 0 : i32
    %c0_i32_0 = arith.constant 0 : i32
    return %arg0, %c0_i32 : i32, i32
  }
}

</mosaic_0001>

<bundles_post_ra>
// kernel: tpu_custom_call.1
= control target key start
LH: loop header
LB: loop body
LE: loop exit
PB: predicated region body
PF: predicated region fallthrough
CT: control target
= control target key end

     0   :  { %9 = vsyncpa [#allocation3], 0  ;;  %s890_s0 = inlined_call_operand.vmem [shape: f32[1,32], index: 0, kind: input, shape index: {}]   ;;  %s891_s1 = inlined_call_operand.vmem [shape: f32[16,1], index: 1, kind: input, shape index: {}]   ;;  %s892_s2 = inlined_call_operand.hbm [shape: f32[16,32], index: 2, kind: output, shape index: {0}]   ;;  %s893_s3 = inlined_call_operand.hbm [shape: f32[16,32], index: 3, kind: output, shape index: {1}]  }
   0x1   :  { %11 = vsyncpa [#allocation3 + $0x1], 0 }
   0x2   :  { %12 = vsyncpa [#allocation5], 0 }
   0x3   :  { %14 = vsyncpa [#allocation5 + $0x1], 0  ;;  %s731_s12 = smov 0   ;;  %s733_s13 = smov 0  }
   0x4   :  { %s735_s14 = smov 0   ;;  %s737_s15 = smov 0  }
   0x5 LB: > { %s752_s16 = sadd.s32 4294967295, %s700_s15   ;;  %s524_s17 = sadd.s32 4294967294, %s700_s15   ;;  %s700_s15 = sphi %s737_s15, %s899_s15   ;;  %s696_s14 = sphi %s735_s14, %s898_s14   ;;  %s692_s13 = sphi %s733_s13, %s897_s13   ;;  %s688_s12 = sphi %s731_s12, %s896_s12  }
   0x6   : > { %s756_s18 = sadd.s32 1, %s700_s15   ;;  %s74_s19 = sadd.s32 1, %s696_s14 }
   0x7   : > { %s71_s20 = ssub.s32 %s700_s15, %s756_s18  ;;  %p84_p0 = scmp.ne.s32.totalorder %s696_s14, %s692_s13 }
   0x8   : > { %p72_p1 = scmp.eq.s32.totalorder %s71_s20, 0  ;;  %p85_p2 = scmp.eq.s32.totalorder %s752_s16, 1 }
   0x9   : > { %p90_p3 = scmp.ne.s32.totalorder %s692_s13, %s688_s12  ;;  %p91_p4 = scmp.eq.s32.totalorder %s524_s17, 1 }
   0xa   : > { %s767_s21 = scalar_select %p72_p1, %s696_s14, %s74_s19  }
   0xb   : > { %p769_p5 = por %p85_p2, %p84_p0  ;;  %p773_p6 = por %p91_p4, %p90_p3 }
   0xc   : > { %p527_p7 = scmp.ge.s32.totalorder %s700_s15, 1  ;;  %p145_p8 = scmp.lt.s32.totalorder %s700_s15, 3 }
   0xe   : > { %p146_p9 = pnand %p527_p7, %p145_p8 }
   0xf   : > { %p173_p10 = scmp.lt.s32.totalorder (!%p146_p9), %s752_s16, 1  ;;  %v702_v0 = vmov (!%p146_p9), 0   ;;  %v531_v2 = vld [vmem:[%s890_s0] ss:$0 sm:$0xff] (!%p146_p9)  ;;  %v703_v15 = vmov (!%p146_p9), 683565275  }
  0x10   : > { %149 = sbr.rel (%p146_p9) target bundleno = 274 (0x112), region = 28  ;;  %601 = vset.pattern.permute.xlu0 (!%p146_p9), %v702_v0  ;;  %v704_v17 = vmov (!%p146_p9), 2475754826   ;;  %v705_v20 = vmov (!%p146_p9), 2131351028   ;;  %s808_s4 = sand.u32 (!%p146_p9), 1, %s692_s13  }
  0x11   : > { %v706_v23 = vmov (!%p146_p9), 2102212464   ;;  %v707_v26 = vmov (!%p146_p9), 920167782   ;;  %v708_v29 = vmov (!%p146_p9), 1326507024  }
  0x12   : > { %s528_s5 = sshll.u32 (!%p146_p9), %s808_s4, 3  ;;  %s542_s6 = sshll.u32 (!%p146_p9), %s752_s16, 7  ;;  %vm294_vm10 = vcmask (!%p146_p9), 261120  }
  0x13   : > { %s165_s7 = scalar_lea.vmem (!%p146_p9), [#allocation2], %s528_s5  ;;  %s172_s9 = scalar_lea.vmem (!%p146_p9), [#allocation4], %s528_s5 }
  0x14   : > { %s420_s8 = sshll.u32 (!%p146_p9), %s165_s7, 4  ;;  %s433_s10 = sshll.u32 (!%p146_p9), %s172_s9, 4  ;;  %s818_s8 = int_to_ptr.vmem [resolvable:$true] %s420_s8  ;;  %s825_s10 = int_to_ptr.vmem [resolvable:$true] %s433_s10 }
  0x15   : > { %s815_s19 = scalar_lea.hbm (!%p146_p9), %s892_s2, %s542_s6  ;;  %s606_s26 = scalar_lea.vmem (!%p146_p9), %s818_s8, 128 }
  0x16   : > { %p607_p11 = scmp.ne.s32.totalorder (!%p146_p9), %s818_s8, %s606_s26  ;;  %s709_s27 = smov (!%p146_p9), [#allocation2]  }
  0x17   : > { %s174_s24 = scalar_select %p173_p10, %s752_s16, 1 }
  0x18   : > { %p608_p12 = pnand %p607_p11, %p769_p5 }
  0x19   : > { %s530_s25 = sshll.u32 %s174_s24, 3  ;;  %s823_s24 = scalar_lea.hbm %s893_s3, %s542_s6 }
  0x1a   : > { %s176_s28 = scalar_lea.vmem %s891_s1, %s530_s25  ;;  %s402_s25 = scalar_lea.sflag [#allocation3], %s808_s4 }
  0x1b   : > { %v177_v1 = vld [vmem:[%s176_s28] sm:$0xff]  ;;  %p609_p13 = pneg %p608_p12  ;;  %s610_s28 = sshll.u32 %s709_s27, 4  ;;  %s611_s28 = int_to_ptr.vmem [resolvable:$false] %s610_s28 }
  0x1c   : > { %181 = vperm.xlu0 %601, %v177_v1   ;;  %s612_s29 = scalar_lea.vmem %s611_s28, 256  ;;  %p613_p0 = scmp.lt.s32.totalorder %s818_s8, %s611_s28 }
  0x1d   : > { %p614_p1 = scmp.lt.s32.totalorder %s612_s29, %s606_s26 }
  0x1f   : > { %p615_p2 = por %p614_p1, %p613_p0 }
  0x21   : > { %p616_p3 = pnand %p615_p2, %p609_p13 }
  0x9b   : > { %v182_v3 = vpop.permute.xlu0 %181 }
  0x9c   : > { %v787_v4 = vmul.f32 %v531_v2, %v182_v3 }
  0x9e   : > { %v194_v5 = vand.u32 2139095040, %v787_v4  ;;  %v191_v9 = vand.u32 2147483647, %v787_v4  ;;  %vm193_vm7 = vcmp.lt.s32.totalorder %v787_v4, 0 }
  0xa0   : > { %v195_v6 = vshrl.u32 %v194_v5, 23  ;;  %v198_v12 = vand.u32 8388607, %v191_v9  ;;  %vm192_vm8 = vcmp.le.f32.partialorder %v191_v9, 0.7853982 }
  0xa2   : > { %v532_v7 = vadd.s32 4294967169, %v195_v6  ;;  %v199_v31 = vor.u32 8388608, %v198_v12 }
  0xa4   : > { %v201_v8 = vadd.s32 1, %v532_v7  ;;  %v239_v45 = vshll.u32 %v199_v31, 8 }
  0xa6   : > { %vm202_vm0 = vcmp.gt.s32.totalorder %v201_v8, 0 }
  0xa7   : > { %v203_v10 = vsel %vm202_vm0, %v201_v8, 0  ;;  %vm283_vm0 = vweird.f32 %v787_v4 }
  0xa8   : > { %v205_v11 = vand.u32 31, %v203_v10  ;;  %v204_v14 = vshrl.u32 %v203_v10, 5 }
  0xaa   : > { %v206_v13 = vsub.s32 32, %v205_v11  ;;  %v208_v16 = vshll.u32 %v703_v15, %v205_v11  ;;  %v211_v18 = vshll.u32 %v704_v17, %v205_v11  ;;  %v214_v22 = vshll.u32 %v705_v20, %v205_v11 }
  0xab   : > { %v217_v25 = vshll.u32 %v706_v23, %v205_v11  ;;  %v220_v28 = vshll.u32 %v707_v26, %v205_v11  ;;  %vm223_vm1 = vcmp.lt.s32.totalorder %v204_v14, 1  ;;  %vm226_vm2 = vcmp.lt.s32.totalorder %v204_v14, 4 }
  0xac   : > { %v209_v19 = vshrl.u32 %v704_v17, %v206_v13  ;;  %v212_v21 = vshrl.u32 %v705_v20, %v206_v13  ;;  %v215_v24 = vshrl.u32 %v706_v23, %v206_v13  ;;  %v218_v27 = vshrl.u32 %v707_v26, %v206_v13 }
  0xad   : > { %v221_v30 = vshrl.u32 %v708_v29, %v206_v13  ;;  %v207_v40 = vshrl.u32 %v703_v15, %v206_v13  ;;  %vm225_vm3 = vcmp.lt.s32.totalorder %v204_v14, 3  ;;  %vm224_vm4 = vcmp.lt.s32.totalorder %v204_v14, 2 }
  0xae   : > { %v210_v32 = vor.u32 %v209_v19, %v208_v16  ;;  %v213_v33 = vor.u32 %v212_v21, %v211_v18  ;;  %v216_v34 = vor.u32 %v215_v24, %v214_v22  ;;  %v219_v35 = vor.u32 %v218_v27, %v217_v25 }
  0xaf   : > { %v222_v36 = vor.u32 %v221_v30, %v220_v28 }
  0xb0   : > { %v228_v37 = vsel %vm226_vm2, %v216_v34, 2102212464  ;;  %v231_v38 = vsel %vm223_vm1, %v210_v32, %v213_v33  ;;  %v235_v39 = vsel %vm223_vm1, %v213_v33, %v216_v34  ;;  %v232_v41 = vsel %vm226_vm2, %v219_v35, 920167782 }
  0xb1   : > { %v236_v42 = vsel %vm226_vm2, %v222_v36, 1326507024  ;;  %v233_v43 = vsel %vm225_vm3, %v216_v34, %v232_v41  ;;  %v227_v46 = vsel %vm223_vm1, %v207_v40, %v210_v32  ;;  %v229_v47 = vsel %vm225_vm3, %v213_v33, %v228_v37 }
  0xb2   : > { %v237_v44 = vsel %vm225_vm3, %v219_v35, %v236_v42  ;;  %v234_v48 = vsel %vm224_vm4, %v231_v38, %v233_v43  ;;  %v230_v54 = vsel %vm224_vm4, %v227_v46, %v229_v47 }
  0xb3   : > { %v238_v49 = vsel %vm224_vm4, %v235_v39, %v237_v44  ;;  %v796_v52 = vmul.u32.u64.low %v239_v45, %v234_v48  ;;  %v797_v53 = vmul.u32.u64.high %v239_v45, %v234_v48, %v796_v52  ;;  %v246_v56 = vmul.u32 %v239_v45, %v230_v54 }
  0xb4   : > { %v793_v50 = vmul.u32.u64.low %v239_v45, %v238_v49  ;;  %v794_v51 = vmul.u32.u64.high %v239_v45, %v238_v49, %v793_v50 }
  0xb5   : > { %v249_v55 = vadd.s32 1, %v797_v53 }
  0xb6   : > { %vm248_vm5 = vc.u32 %v794_v51, %v796_v52  ;;  %v247_v5 = vadd.s32 %v796_v52, %v794_v51 }
  0xb7   : > { %v250_v57 = vsel %vm248_vm5, %v249_v55, %v797_v53 }
  0xb8   : > { %v251_v58 = vadd.s32 %v250_v57, %v246_v56 }
  0xba   : > { %v252_v59 = vadd.s32 536870912, %v251_v58 }
  0xbc   : > { %v253_v60 = vshrl.u32 %v252_v59, 30 }
  0xbe   : > { %v254_v61 = vshll.u32 %v253_v60, 30  ;;  %v277_v18 = vsub.s32 4, %v253_v60 }
  0xc0   : > { %v255_v62 = vsub.s32 %v251_v58, %v254_v61  ;;  %v278_v21 = vsel %vm193_vm7, %v277_v18, %v253_v60 }
  0xc1   : > { %v280_v23 = vsel %vm192_vm8, 0, %v278_v21 }
  0xc2   : > { %v257_v63 = vsub.s32 0, %v255_v62  ;;  %v389_v24 = vadd.s32 3, %v280_v23  ;;  %v284_v25 = vand.u32 3, %v280_v23 }
  0xc4   : > { %v533_v0 = vmin.u32 %v257_v63, %v255_v62  ;;  %v390_v26 = vand.u32 3, %v389_v24  ;;  %vm289_vm9 = vcmp.eq.s32.totalorder %v284_v25, 2  ;;  %vm286_vm12 = vcmp.eq.s32.totalorder %v284_v25, 0 }
  0xc5   : > { %vm285_vm14 = vcmp.lt.s32.totalorder %v284_v25, 2 }
  0xc6   : > { %v259_v1 = vclz %v533_v0  ;;  %vm395_vm11 = vcmp.eq.s32.totalorder %v390_v26, 2  ;;  %vm392_vm13 = vcmp.eq.s32.totalorder %v390_v26, 0  ;;  %vm391_vm15 = vcmp.lt.s32.totalorder %v390_v26, 2 }
  0xc8   : > { %v534_v2 = vadd.s32 4294967294, %v259_v1 }
  0xca   : > { %vm535_vm6 = vcmp.lt.s32.totalorder %v534_v2, 0 }
  0xcb   : > { %v262_v3 = vsel %vm535_vm6, 0, %v534_v2 }
  0xcc   : > { %v263_v6 = vsub.s32 32, %v262_v3  ;;  %v267_v7 = vsub.s32 4294967266, %v262_v3  ;;  %v264_v8 = vshll.u32 %v255_v62, %v262_v3 }
  0xce   : > { %v265_v10 = vshrl.u32 %v247_v5, %v263_v6  ;;  %v268_v11 = vadd.s32 127, %v267_v7 }
  0xd0   : > { %v266_v12 = vor.u32 %v265_v10, %v264_v8  ;;  %v269_v13 = vshll.u32 %v268_v11, 23 }
  0xd2   : > { %v270_v14 = vor.u32 4788187, %v269_v13  ;;  %v273_v16 = vcvt.s32.f32 %v266_v12 }
  0xd4   : > { %v271_v15 = vand.u32 2147483647, %v270_v14 }
  0xd6   : > { %v274_v17 = vmul.f32 %v273_v16, %v271_v15 }
  0xd8   : > { %v275_v19 = vxor.u32 2147483648, %v274_v17 }
  0xda   : > { %v276_v20 = vsel %vm193_vm7, %v275_v19, %v274_v17 }
  0xdb   : > { %v279_v22 = vsel %vm192_vm8, %v787_v4, %v276_v20 }
  0xdc   : > { %602 = vcosq.f32 %v279_v22 }
  0xdd   : > { %604 = vsinq.f32 %v279_v22 }
  0xe6   : > { %v603_v27 = vpop.eup %602 }
  0xe7   : > { %v605_v28 = vpop.eup %604  ;;  %v290_v29 = vxor.u32 2147483648, %v603_v27 }
  0xe8   : > { %v287_v30 = vxor.u32 2147483648, %v605_v28 }
  0xe9   : > { %v291_v9 = vsel %vm289_vm9, %v290_v29, %v605_v28  ;;  %v397_v31 = vsel %vm395_vm11, %v290_v29, %v605_v28 }
  0xea   : > { %v288_v32 = vsel %vm286_vm12, %v603_v27, %v287_v30  ;;  %v394_v33 = vsel %vm392_vm13, %v603_v27, %v287_v30 }
  0xeb   : > { %v292_v34 = vsel %vm285_vm14, %v288_v32, %v291_v9  ;;  %v398_v35 = vsel %vm391_vm15, %v394_v33, %v397_v31 }
  0xec   : > { %v293_v36 = vsel %vm283_vm0, nan, %v292_v34  ;;  %v399_v37 = vsel %vm283_vm0, nan, %v398_v35 }
  0xed   : > { %295 = vst.msk [vmem:[%s165_s7] sm:$0xff] %vm294_vm10, %v293_v36  ;;  %400 = vst.msk [vmem:[%s172_s9] sm:$0xff] %vm294_vm10, %v399_v37 }
  0xee   : > { %619 = shalt.err (!%p616_p3)
}
  0xef   : > { %s620_s30 = scalar_lea.hbm %s815_s19, 128  ;;  %s624_s7 = scalar_lea.hbm %s892_s2, 256 }
  0xf0   : > { %p621_p4 = scmp.ne.s32.totalorder %s815_s19, %s620_s30  ;;  %p625_p9 = scmp.lt.u32.totalorder %s815_s19, %s892_s2 }
  0xf1   : > { %p626_p10 = scmp.lt.u32.totalorder %s624_s7, %s620_s30  ;;  %p628_p12 = scmp.lt.u32.totalorder %s620_s30, %s815_s19 }
  0xf2   : > { %p622_p7 = pnand %p621_p4, %p769_p5 }
  0xf3   : > { %p627_p11 = por %p626_p10, %p625_p9 }
  0xf4   : > { %p623_p8 = pneg %p622_p7 }
  0xf5   : > { %p629_p13 = por %p628_p12, %p627_p11 }
  0xf7   : > { %p630_p0 = pnand %p629_p13, %p623_p8 }
  0xf9   : > { %633 = shalt.err (!%p630_p0)
}
  0xfa   : > { %550 = dma.vmem_to_hbm [thread:$0]  (%p769_p5), %s818_s8, 128, %s815_s19, %s402_s25  }
  0xfb   : > { %s407_s17 = scalar_lea.sflag [#allocation5], %s808_s4  ;;  %s634_s16 = scalar_lea.vmem %s825_s10, 128 }
  0xfc   : > { %p635_p1 = scmp.ne.s32.totalorder %s825_s10, %s634_s16  ;;  %s710_s20 = smov [#allocation4]  }
  0xfd   : > { %s638_s26 = sshll.u32 %s710_s20, 4  ;;  %s639_s26 = int_to_ptr.vmem [resolvable:$false] %s638_s26 }
  0xfe   : > { %p636_p2 = pnand %p635_p1, %p769_p5  ;;  %s640_s27 = scalar_lea.vmem %s639_s26, 256 }
  0xff   : > { %p641_p4 = scmp.lt.s32.totalorder %s825_s10, %s639_s26  ;;  %p642_p7 = scmp.lt.s32.totalorder %s640_s27, %s634_s16 }
 0x100   : > { %p637_p3 = pneg %p636_p2 }
 0x101   : > { %p643_p8 = por %p642_p7, %p641_p4 }
 0x103   : > { %p644_p9 = pnand %p643_p8, %p637_p3 }
 0x105   : > { %647 = shalt.err (!%p644_p9)
}
 0x106   : > { %s648_s4 = scalar_lea.hbm %s823_s24, 128  ;;  %s652_s25 = scalar_lea.hbm %s893_s3, 256 }
 0x107   : > { %p649_p10 = scmp.ne.s32.totalorder %s823_s24, %s648_s4  ;;  %p653_p13 = scmp.lt.u32.totalorder %s823_s24, %s893_s3 }
 0x108   : > { %p654_p0 = scmp.lt.u32.totalorder %s652_s25, %s648_s4  ;;  %p656_p2 = scmp.lt.u32.totalorder %s648_s4, %s823_s24 }
 0x109   : > { %p650_p11 = pnand %p649_p10, %p769_p5 }
 0x10a   : > { %p655_p1 = por %p654_p0, %p653_p13 }
 0x10b   : > { %p651_p12 = pneg %p650_p11 }
 0x10c   : > { %p657_p3 = por %p656_p2, %p655_p1 }
 0x10e   : > { %p658_p4 = pnand %p657_p3, %p651_p12 }
 0x110   : > { %661 = shalt.err (!%p658_p4)
}
 0x111   : > { %551 = dma.vmem_to_hbm [thread:$0]  (%p769_p5), %s825_s10, 128, %s823_s24, %s407_s17  }
 0x112 PF: > { %p561_p7 = scmp.ge.s32.totalorder %s700_s15, 2  ;;  %s445_s30 = sand.u32 1, %s688_s12  }
 0x113   : > { %s446_s5 = scalar_lea.sflag [#allocation3], %s445_s30 }
 0x114   : > { %p555_p8 = pnand %p561_p7, %p773_p6 }
 0x116   : > { %679 = dma.done.wait (!%p555_p8), %s446_s5, 128  }
 0x117   : > { %681 = vsyncadd (!%p555_p8), %s446_s5, 4294967168  ;;  %s455_s6 = scalar_lea.sflag [#allocation5], %s445_s30 }
 0x118   : > { %683 = dma.done.wait (!%p555_p8), %s455_s6, 128  }
 0x119   : > { %685 = vsyncadd (!%p555_p8), %s455_s6, 4294967168  ;;  %p17_p5 = scmp.ge.s32.totalorder %s756_s18, 4   ;;  %s896_s12 = smov %s692_s13 }
 0x11a   : > { %s897_s13 = smov %s696_s14  ;;  %s898_s14 = smov %s767_s21 }
 0x11b   : > { %s899_s15 = smov %s756_s18  ;;  %19 = sbr.rel (!%p17_p5) target bundleno = 5 (0x5), region = 80 }
 0x122   :  { %460 = vsyncpa [#allocation3], 1 }
 0x123   :  { %462 = vsyncpa [#allocation3 + $0x1], 1 }
 0x124   :  { %463 = vsyncpa [#allocation5], 1 }
 0x125   :  { %465 = vsyncpa [#allocation5 + $0x1], 1 }

</bundles_post_ra>
